<compile_context>
chip_gen: v7x
topology: tpu7x:2x2x1
jax: 0.10.0
libtpu: 0.0.40
codegen_flags: <defaults>
</compile_context>

<pallas_src>
import functools

import jax
import jax.numpy as jnp
from jax.experimental import pallas as pl
from jax.experimental.pallas import tpu as pltpu

_DEF_COMPUTE_DTYPE = jnp.bfloat16


def _round_up(x, m):
    return (x + m - 1) // m * m


def _vmem_ceiling_bytes():
    """~75% of the current chip's physical VMEM (generation-aware clamp)."""
    try:
        cap = int(pltpu.get_tpu_info().vmem_capacity_bytes)
        if cap > 0:
            return (cap * 3) // 4          # ~48 MiB on v7x, ~96 MiB on v5e/v6e
    except Exception:
        pass
    return 48 << 20                        # safe on v7x; conservative elsewhere


def _gru_cell_kernel(x_ref, h_ref, wcat_ref, urz_ref, uh_ref, bcat_ref, out_ref,
                     *, hp, n_sub):
    """One batch-tile of the GRU cell.

    hp    = padded hidden size (multiple of 128 -> lane-dense slices/stores).
    n_sub = static number of batch sub-tiles; independent sub-tiles give the LLO
            scheduler co-issuable MXU + EUP work (matmul of sub-tile k overlaps the
            transcendentals of sub-tile k-1).
    """
    sub_b = x_ref.shape[0] // n_sub
    w_cat = wcat_ref[...]
    u_rz = urz_ref[...]
    u_h = uh_ref[...]
    b_cat = bcat_ref[...]

    for s in range(n_sub):                              # statically unrolled
        rows = pl.ds(s * sub_b, sub_b)                  # static, sublane-aligned start
        x = x_ref[rows, :]
        h = h_ref[rows, :]
        hf = h.astype(jnp.float32)

        # Fused input-side matmul + fused f32 bias add: (sub_b, 3*hp).
        gx = jnp.dot(x, w_cat, preferred_element_type=jnp.float32) + b_cat
        # Fused hidden-side matmul for the r and z gates: (sub_b, 2*hp).
        gh = jnp.dot(h, u_rz, preferred_element_type=jnp.float32)

        # sigmoid(a) = 0.5 * tanh(0.5 * a) + 0.5  -> single EUP op per gate.
        r = 0.5 * jnp.tanh(0.5 * (gx[:, 0 * hp:1 * hp] + gh[:, 0 * hp:1 * hp])) + 0.5
        z = 0.5 * jnp.tanh(0.5 * (gx[:, 1 * hp:2 * hp] + gh[:, 1 * hp:2 * hp])) + 0.5

        # Candidate: r applied BEFORE the U_h matmul (matches the reference module).
        rh = (r * hf).astype(uh_ref.dtype)
        h_hat = jnp.tanh(gx[:, 2 * hp:3 * hp]
                         + jnp.dot(rh, u_h, preferred_element_type=jnp.float32))

        # (1 - z) * h_hat + z * h  ==  h_hat + z * (h - h_hat)
        out_ref[rows, :] = (h_hat + z * (hf - h_hat)).astype(out_ref.dtype)


def pack_gru_params(params, *, compute_dtype=_DEF_COMPUTE_DTYPE):
    """Pad / concatenate / cast the GRU weights once (hoist out of per-step calls).

    Returns a dict consumable by gru_cell: w_cat=[W_r|W_z|W_h] (I, 3Hp) in
    compute_dtype, u_rz=[U_r|U_z] (Hp, 2Hp), u_h (Hp, Hp), b_cat (1, 3Hp) in f32,
    plus size metadata.  Zero padding keeps the math exact in the live region.
    """
    cdt = jnp.dtype(compute_dtype)
    I, H = params["W_r"].shape
    Hp = _round_up(H, 128)
    f32 = jnp.float32

    def pad_w(w):   # (I, H) -> (I, Hp)
        return jnp.pad(w, ((0, 0), (0, Hp - H))).astype(cdt)

    def pad_u(u):   # (H, H) -> (Hp, Hp)
        return jnp.pad(u, ((0, Hp - H), (0, Hp - H))).astype(cdt)

    def pad_b(b):   # (H,) or None -> (1, Hp) f32 (added to the f32 accumulator)
        if b is None:
            b = jnp.zeros((H,), f32)
        return jnp.pad(b.astype(f32), (0, Hp - H)).reshape(1, Hp)

    return {
        "w_cat": jnp.concatenate(
            [pad_w(params["W_r"]), pad_w(params["W_z"]), pad_w(params["W_h"])], axis=1),
        "u_rz": jnp.concatenate([pad_u(params["U_r"]), pad_u(params["U_z"])], axis=1),
        "u_h": pad_u(params["U_h"]),
        "b_cat": jnp.concatenate(
            [pad_b(params.get("b_r")), pad_b(params.get("b_z")), pad_b(params.get("b_h"))],
            axis=1),
        "input_size": I,
        "hidden_size": H,
        "hidden_padded": Hp,
        "compute_dtype": cdt,
    }


def gru_cell(x, h_prev, params, *, compute_dtype=_DEF_COMPUTE_DTYPE, block_b=256):
    """GRU cell forward.

    params: either the raw dict {W_r,U_r,b_r,W_z,U_z,b_z,W_h,U_h,b_h} or the output
    of pack_gru_params().  compute_dtype controls the MXU operand dtype (default
    bfloat16); accumulation and gate math are always float32.
    """
    if "w_cat" not in params:
        params = pack_gru_params(params, compute_dtype=compute_dtype)
    cdt = jnp.dtype(params["compute_dtype"])
    I, H, Hp = params["input_size"], params["hidden_size"], params["hidden_padded"]

    B = x.shape[0]
    assert x.shape == (B, I) and h_prev.shape == (B, H)
    out_dtype = x.dtype

    vmem_ceiling = _vmem_ceiling_bytes()
    if vmem_ceiling <= (48 << 20) and Hp >= 2048:
        block_b = min(block_b, 128)   # v7x-class (64 MiB VMEM): shrink batch tile

    # Padding targets: lane-dense hidden dim, sublane-aligned batch tile.
    sub = 8 if cdt.itemsize >= 4 else 16
    tb = min(_round_up(B, sub), _round_up(block_b, sub))
    # Guarantee >= 2 batch tiles when possible so "parallel" feeds both v7x TCs.
    if _round_up(B, tb) // tb == 1 and tb >= 2 * sub:
        tb = _round_up(-(-B // 2), sub)
    Bp = _round_up(B, tb)
    # Intra-tile sub-tiling only when both halves stay sublane-packing aligned.
    n_sub = 2 if (tb >= 2 * sub and tb % (2 * sub) == 0) else 1

    x_p = jnp.pad(x, ((0, Bp - B), (0, 0))).astype(cdt)
    h_p = jnp.pad(h_prev, ((0, Bp - B), (0, Hp - H))).astype(cdt)

    w_cat, u_rz, u_h, b_cat = params["w_cat"], params["u_rz"], params["u_h"], params["b_cat"]

    # VMEM budget: weights counted once (single-buffered), activations double-
    # buffered, f32 intermediates (gx 3Hp + gh 2Hp + gates/blend ~4Hp), + headroom.
    itm = cdt.itemsize
    weight_bytes = (w_cat.size + u_rz.size + u_h.size) * itm + b_cat.size * 4
    act_bytes = tb * (I + Hp) * itm + tb * Hp * jnp.dtype(out_dtype).itemsize
    interm_bytes = tb * (9 * Hp) * 4
    vmem_limit = int(min(max(weight_bytes + 2 * act_bytes + interm_bytes + (2 << 20),
                             16 << 20),
                         vmem_ceiling))

    kernel = functools.partial(_gru_cell_kernel, hp=Hp, n_sub=n_sub)

    def build(weight_specs):
        return pl.pallas_call(
            kernel,
            out_shape=jax.ShapeDtypeStruct((Bp, Hp), out_dtype),
            grid=(Bp // tb,),
            in_specs=[
                pl.BlockSpec((tb, I), lambda i: (i, 0)),    # x       (streamed)
                pl.BlockSpec((tb, Hp), lambda i: (i, 0)),   # h_prev  (streamed)
                *weight_specs,                              # VMEM-resident weights
            ],
            out_specs=pl.BlockSpec((tb, Hp), lambda i: (i, 0)),
            compiler_params=pltpu.CompilerParams(
                dimension_semantics=("parallel",),          # batch tiles -> both v7x TCs
                vmem_limit_bytes=vmem_limit,
            ),
        )

    const_map = lambda i: (0, 0)
    weight_shapes = [(I, 3 * Hp), (Hp, 2 * Hp), (Hp, Hp), (1, 3 * Hp)]
    try:
        specs = [pl.BlockSpec(s, const_map, pipeline_mode=pl.Buffered(1))
                 for s in weight_shapes]
        out = jax.block_until_ready(build(specs)(x_p, h_p, w_cat, u_rz, u_h, b_cat))
    except Exception:
        # TODO(synk): drop this fallback once pl.Buffered(1) is universally supported.
        specs = [pl.BlockSpec(s, const_map) for s in weight_shapes]
        out = jax.block_until_ready(build(specs)(x_p, h_p, w_cat, u_rz, u_h, b_cat))

    return out[:B, :H]


def gru_cell_ref(x, h, p):
    """Pure-JAX reference mirroring the PyTorch forward."""
    lin = lambda W, U, b, hh: x @ W + hh @ U + b
    r = jax.nn.sigmoid(lin(p["W_r"], p["U_r"], p["b_r"], h))
    z = jax.nn.sigmoid(lin(p["W_z"], p["U_z"], p["b_z"], h))
    h_hat = jnp.tanh(lin(p["W_h"], p["U_h"], p["b_h"], r * h))
    return (1.0 - z) * h_hat + z * h


def init_params(key, input_size, hidden_size, dtype=jnp.float32):
    """Deterministic init mimicking kaiming_normal_ for weights, zeros for biases."""
    keys = jax.random.split(key, 6)
    std_w = (2.0 / input_size) ** 0.5
    std_u = (2.0 / hidden_size) ** 0.5
    return {
        "W_r": jax.random.normal(keys[0], (input_size, hidden_size), dtype) * std_w,
        "U_r": jax.random.normal(keys[1], (hidden_size, hidden_size), dtype) * std_u,
        "b_r": jnp.zeros((hidden_size,), dtype),
        "W_z": jax.random.normal(keys[2], (input_size, hidden_size), dtype) * std_w,
        "U_z": jax.random.normal(keys[3], (hidden_size, hidden_size), dtype) * std_u,
        "b_z": jnp.zeros((hidden_size,), dtype),
        "W_h": jax.random.normal(keys[4], (input_size, hidden_size), dtype) * std_w,
        "U_h": jax.random.normal(keys[5], (hidden_size, hidden_size), dtype) * std_u,
        "b_h": jnp.zeros((hidden_size,), dtype),
    }


if __name__ == "__main__":
    key = jax.random.PRNGKey(0)
    k_x, k_h, k_p, k_x2, k_h2, k_p2 = jax.random.split(key, 6)

    # --- test 1: demo sizes, default bf16 MXU path (f32 accumulation / gate math) ---
    batch, input_size, hidden_size = 8, 16, 32
    x = jax.random.normal(k_x, (batch, input_size), jnp.float32)
    h_prev = jax.random.normal(k_h, (batch, hidden_size), jnp.float32)
    params = init_params(k_p, input_size, hidden_size)
    h_ref = gru_cell_ref(x, h_prev, params)

    h_bf16 = jax.block_until_ready(gru_cell(x, h_prev, params))
    assert h_bf16.shape == (batch, hidden_size)
    assert jnp.allclose(h_bf16, h_ref, atol=8e-2, rtol=5e-2), "bf16 mismatch vs reference"

    # --- test 2: f32 MXU path, tight tolerance ---
    h_f32 = jax.block_until_ready(gru_cell(x, h_prev, params, compute_dtype=jnp.float32))
    assert jnp.allclose(h_f32, h_ref, atol=1e-4, rtol=1e-4), "f32 mismatch vs reference"

    # --- test 3: non-aligned sizes (padding, 2 batch tiles, intra-kernel sub-tiles) ---
    b2, i2, hd2 = 20, 24, 96
    x2 = jax.random.normal(k_x2, (b2, i2), jnp.float32)
    h2 = jax.random.normal(k_h2, (b2, hd2), jnp.float32)
    p2 = init_params(k_p2, i2, hd2)
    ref2 = gru_cell_ref(x2, h2, p2)
    out2 = jax.block_until_ready(gru_cell(x2, h2, p2, compute_dtype=jnp.float32))
    assert out2.shape == (b2, hd2)
    assert jnp.allclose(out2, ref2, atol=1e-4, rtol=1e-4), "padded f32 mismatch vs reference"

    # --- test 4: pre-packed params path (weight repack hoisted out of the call) ---
    packed = pack_gru_params(p2)  # bf16 default
    out2_packed = jax.block_until_ready(gru_cell(x2, h2, packed))
    assert out2_packed.shape == (b2, hd2)
    assert jnp.allclose(out2_packed, ref2, atol=8e-2, rtol=5e-2), "packed bf16 mismatch"

    print("KERNEL_OK")
</pallas_src>

<mosaic_0001>
module attributes {stable_mosaic.version = 11 : i64} {
  func.func @_gru_cell_kernel(%arg0: i32, %arg1: memref<16x16xbf16, #tpu.memory_space<vmem>>, %arg2: memref<16x128xbf16, #tpu.memory_space<vmem>>, %arg3: memref<16x384xbf16, #tpu.memory_space<vmem>>, %arg4: memref<128x256xbf16, #tpu.memory_space<vmem>>, %arg5: memref<128x128xbf16, #tpu.memory_space<vmem>>, %arg6: memref<1x384xf32, #tpu.memory_space<vmem>>, %arg7: memref<16x128xf32, #tpu.memory_space<vmem>>) attributes {dimension_semantics = [#tpu.dimension_semantics<parallel>], iteration_bounds = array<i64: 1>, scalar_prefetch = 0 : i64, scratch_operands = 0 : i64, tpu.core_type = #tpu.core_type<tc>, window_params = [{transform_indices = @transform_0, window_bounds = array<i64: 16, 16>}, {transform_indices = @transform_1, window_bounds = array<i64: 16, 128>}, {pipeline_mode = #tpu.pipeline_mode<synchronous>, transform_indices = @transform_2, window_bounds = array<i64: 16, 384>}, {pipeline_mode = #tpu.pipeline_mode<synchronous>, transform_indices = @transform_3, window_bounds = array<i64: 128, 256>}, {pipeline_mode = #tpu.pipeline_mode<synchronous>, transform_indices = @transform_4, window_bounds = array<i64: 128, 128>}, {pipeline_mode = #tpu.pipeline_mode<synchronous>, transform_indices = @transform_5, window_bounds = array<i64: 1, 384>}, {transform_indices = @transform_6, window_bounds = array<i64: 16, 128>}]} {
    %c0 = arith.constant 0 : index
    %c0_0 = arith.constant 0 : index
    %0 = vector.load %arg3[%c0, %c0_0] : memref<16x384xbf16, #tpu.memory_space<vmem>>, vector<16x384xbf16>
    %c0_1 = arith.constant 0 : index
    %c0_2 = arith.constant 0 : index
    %1 = vector.load %arg4[%c0_1, %c0_2] : memref<128x256xbf16, #tpu.memory_space<vmem>>, vector<128x256xbf16>
    %c0_3 = arith.constant 0 : index
    %c0_4 = arith.constant 0 : index
    %2 = vector.load %arg5[%c0_3, %c0_4] : memref<128x128xbf16, #tpu.memory_space<vmem>>, vector<128x128xbf16>
    %c0_5 = arith.constant 0 : index
    %c0_6 = arith.constant 0 : index
    %3 = vector.load %arg6[%c0_5, %c0_6] : memref<1x384xf32, #tpu.memory_space<vmem>>, vector<1x384xf32>
    %c0_7 = arith.constant 0 : index
    %c0_8 = arith.constant 0 : index
    %4 = vector.load %arg1[%c0_7, %c0_8] : memref<16x16xbf16, #tpu.memory_space<vmem>>, vector<16x16xbf16>
    %c0_9 = arith.constant 0 : index
    %c0_10 = arith.constant 0 : index
    %5 = vector.load %arg2[%c0_9, %c0_10] : memref<16x128xbf16, #tpu.memory_space<vmem>>, vector<16x128xbf16>
    %6 = arith.extf %5 : vector<16x128xbf16> to vector<16x128xf32>
    %cst = arith.constant dense<0.000000e+00> : vector<16x384xf32>
    %7 = tpu.matmul %4, %0, %cst {dimension_numbers = #tpu.dot_dimension_numbers<[1], [0], [0], [1], [0, 0, 1, 1], [], []>} : vector<16x16xbf16>, vector<16x384xbf16>, vector<16x384xf32> -> vector<16x384xf32>
    %8 = vector.broadcast %3 : vector<1x384xf32> to vector<16x384xf32>
    %9 = arith.addf %7, %8 : vector<16x384xf32>
    %cst_11 = arith.constant dense<0.000000e+00> : vector<16x256xf32>
    %10 = tpu.matmul %5, %1, %cst_11 {dimension_numbers = #tpu.dot_dimension_numbers<[1], [0], [0], [1], [0, 0, 1, 1], [], []>} : vector<16x128xbf16>, vector<128x256xbf16>, vector<16x256xf32> -> vector<16x256xf32>
    %11 = vector.extract_strided_slice %9 {offsets = [0, 0], sizes = [16, 128], strides = [1, 1]} : vector<16x384xf32> to vector<16x128xf32>
    %12 = vector.extract_strided_slice %10 {offsets = [0, 0], sizes = [16, 128], strides = [1, 1]} : vector<16x256xf32> to vector<16x128xf32>
    %13 = arith.addf %11, %12 : vector<16x128xf32>
    %cst_12 = arith.constant 5.000000e-01 : f32
    %14 = vector.broadcast %cst_12 : f32 to vector<16x128xf32>
    %15 = arith.mulf %14, %13 : vector<16x128xf32>
    %16 = math.tanh %15 : vector<16x128xf32>
    %cst_13 = arith.constant 5.000000e-01 : f32
    %17 = vector.broadcast %cst_13 : f32 to vector<16x128xf32>
    %18 = arith.mulf %17, %16 : vector<16x128xf32>
    %cst_14 = arith.constant 5.000000e-01 : f32
    %19 = vector.broadcast %cst_14 : f32 to vector<16x128xf32>
    %20 = arith.addf %18, %19 : vector<16x128xf32>
    %21 = vector.extract_strided_slice %9 {offsets = [0, 128], sizes = [16, 128], strides = [1, 1]} : vector<16x384xf32> to vector<16x128xf32>
    %22 = vector.extract_strided_slice %10 {offsets = [0, 128], sizes = [16, 128], strides = [1, 1]} : vector<16x256xf32> to vector<16x128xf32>
    %23 = arith.addf %21, %22 : vector<16x128xf32>
    %cst_15 = arith.constant 5.000000e-01 : f32
    %24 = vector.broadcast %cst_15 : f32 to vector<16x128xf32>
    %25 = arith.mulf %24, %23 : vector<16x128xf32>
    %26 = math.tanh %25 : vector<16x128xf32>
    %cst_16 = arith.constant 5.000000e-01 : f32
    %27 = vector.broadcast %cst_16 : f32 to vector<16x128xf32>
    %28 = arith.mulf %27, %26 : vector<16x128xf32>
    %cst_17 = arith.constant 5.000000e-01 : f32
    %29 = vector.broadcast %cst_17 : f32 to vector<16x128xf32>
    %30 = arith.addf %28, %29 : vector<16x128xf32>
    %31 = arith.mulf %20, %6 : vector<16x128xf32>
    %32 = arith.truncf %31 : vector<16x128xf32> to vector<16x128xbf16>
    %33 = vector.extract_strided_slice %9 {offsets = [0, 256], sizes = [16, 128], strides = [1, 1]} : vector<16x384xf32> to vector<16x128xf32>
    %cst_18 = arith.constant dense<0.000000e+00> : vector<16x128xf32>
    %34 = tpu.matmul %32, %2, %cst_18 {dimension_numbers = #tpu.dot_dimension_numbers<[1], [0], [0], [1], [0, 0, 1, 1], [], []>} : vector<16x128xbf16>, vector<128x128xbf16>, vector<16x128xf32> -> vector<16x128xf32>
    %35 = arith.addf %33, %34 : vector<16x128xf32>
    %36 = math.tanh %35 : vector<16x128xf32>
    %37 = arith.subf %6, %36 : vector<16x128xf32>
    %38 = arith.mulf %30, %37 : vector<16x128xf32>
    %39 = arith.addf %36, %38 : vector<16x128xf32>
    %c0_19 = arith.constant 0 : index
    %c0_20 = arith.constant 0 : index
    %40 = vector.load %arg7[%c0_19, %c0_20] : memref<16x128xf32, #tpu.memory_space<vmem>>, vector<16x128xf32>
    tpu.vector_store %arg7[%c0_19, %c0_20], %39 {strides = array<i32>} : memref<16x128xf32, #tpu.memory_space<vmem>>, vector<16x128xf32>,
    return
  }
  func.func @transform_0(%arg0: i32) -> (i32, i32) {
    %c0_i32 = arith.constant 0 : i32
    %c0_i32_0 = arith.constant 0 : i32
    return %arg0, %c0_i32 : i32, i32
  }
  func.func @transform_1(%arg0: i32) -> (i32, i32) {
    %c0_i32 = arith.constant 0 : i32
    %c0_i32_0 = arith.constant 0 : i32
    return %arg0, %c0_i32 : i32, i32
  }
  func.func @transform_2(%arg0: i32) -> (i32, i32) {
    %c0_i32 = arith.constant 0 : i32
    %c0_i32_0 = arith.constant 0 : i32
    %c0_i32_1 = arith.constant 0 : i32
    return %c0_i32, %c0_i32_0 : i32, i32
  }
  func.func @transform_3(%arg0: i32) -> (i32, i32) {
    %c0_i32 = arith.constant 0 : i32
    %c0_i32_0 = arith.constant 0 : i32
    %c0_i32_1 = arith.constant 0 : i32
    return %c0_i32, %c0_i32_0 : i32, i32
  }
  func.func @transform_4(%arg0: i32) -> (i32, i32) {
    %c0_i32 = arith.constant 0 : i32
    %c0_i32_0 = arith.constant 0 : i32
    %c0_i32_1 = arith.constant 0 : i32
    return %c0_i32, %c0_i32_0 : i32, i32
  }
  func.func @transform_5(%arg0: i32) -> (i32, i32) {
    %c0_i32 = arith.constant 0 : i32
    %c0_i32_0 = arith.constant 0 : i32
    %c0_i32_1 = arith.constant 0 : i32
    return %c0_i32, %c0_i32_0 : i32, i32
  }
  func.func @transform_6(%arg0: i32) -> (i32, i32) {
    %c0_i32 = arith.constant 0 : i32
    %c0_i32_0 = arith.constant 0 : i32
    return %arg0, %c0_i32 : i32, i32
  }
}

module attributes {stable_mosaic.version = 11 : i64} {
  func.func @_gru_cell_kernel(%arg0: i32, %arg1: memref<16x16xbf16, #tpu.memory_space<vmem>>, %arg2: memref<16x128xbf16, #tpu.memory_space<vmem>>, %arg3: memref<16x384xbf16, #tpu.memory_space<vmem>>, %arg4: memref<128x256xbf16, #tpu.memory_space<vmem>>, %arg5: memref<128x128xbf16, #tpu.memory_space<vmem>>, %arg6: memref<1x384xf32, #tpu.memory_space<vmem>>, %arg7: memref<16x128xf32, #tpu.memory_space<vmem>>) attributes {dimension_semantics = [#tpu.dimension_semantics<parallel>], iteration_bounds = array<i64: 1>, scalar_prefetch = 0 : i64, scratch_operands = 0 : i64, tpu.core_type = #tpu.core_type<tc>, window_params = [{transform_indices = @transform_0, window_bounds = array<i64: 16, 16>}, {transform_indices = @transform_1, window_bounds = array<i64: 16, 128>}, {pipeline_mode = #tpu.pipeline_mode<synchronous>, transform_indices = @transform_2, window_bounds = array<i64: 16, 384>}, {pipeline_mode = #tpu.pipeline_mode<synchronous>, transform_indices = @transform_3, window_bounds = array<i64: 128, 256>}, {pipeline_mode = #tpu.pipeline_mode<synchronous>, transform_indices = @transform_4, window_bounds = array<i64: 128, 128>}, {pipeline_mode = #tpu.pipeline_mode<synchronous>, transform_indices = @transform_5, window_bounds = array<i64: 1, 384>}, {transform_indices = @transform_6, window_bounds = array<i64: 16, 128>}]} {
    %c0 = arith.constant 0 : index
    %c0_0 = arith.constant 0 : index
    %0 = vector.load %arg3[%c0, %c0_0] : memref<16x384xbf16, #tpu.memory_space<vmem>>, vector<16x384xbf16>
    %c0_1 = arith.constant 0 : index
    %c0_2 = arith.constant 0 : index
    %1 = vector.load %arg4[%c0_1, %c0_2] : memref<128x256xbf16, #tpu.memory_space<vmem>>, vector<128x256xbf16>
    %c0_3 = arith.constant 0 : index
    %c0_4 = arith.constant 0 : index
    %2 = vector.load %arg5[%c0_3, %c0_4] : memref<128x128xbf16, #tpu.memory_space<vmem>>, vector<128x128xbf16>
    %c0_5 = arith.constant 0 : index
    %c0_6 = arith.constant 0 : index
    %3 = vector.load %arg6[%c0_5, %c0_6] : memref<1x384xf32, #tpu.memory_space<vmem>>, vector<1x384xf32>
    %c0_7 = arith.constant 0 : index
    %c0_8 = arith.constant 0 : index
    %4 = vector.load %arg1[%c0_7, %c0_8] : memref<16x16xbf16, #tpu.memory_space<vmem>>, vector<16x16xbf16>
    %c0_9 = arith.constant 0 : index
    %c0_10 = arith.constant 0 : index
    %5 = vector.load %arg2[%c0_9, %c0_10] : memref<16x128xbf16, #tpu.memory_space<vmem>>, vector<16x128xbf16>
    %6 = arith.extf %5 : vector<16x128xbf16> to vector<16x128xf32>
    %cst = arith.constant dense<0.000000e+00> : vector<16x384xf32>
    %7 = tpu.matmul %4, %0, %cst {dimension_numbers = #tpu.dot_dimension_numbers<[1], [0], [0], [1], [0, 0, 1, 1], [], []>} : vector<16x16xbf16>, vector<16x384xbf16>, vector<16x384xf32> -> vector<16x384xf32>
    %8 = vector.broadcast %3 : vector<1x384xf32> to vector<16x384xf32>
    %9 = arith.addf %7, %8 : vector<16x384xf32>
    %cst_11 = arith.constant dense<0.000000e+00> : vector<16x256xf32>
    %10 = tpu.matmul %5, %1, %cst_11 {dimension_numbers = #tpu.dot_dimension_numbers<[1], [0], [0], [1], [0, 0, 1, 1], [], []>} : vector<16x128xbf16>, vector<128x256xbf16>, vector<16x256xf32> -> vector<16x256xf32>
    %11 = vector.extract_strided_slice %9 {offsets = [0, 0], sizes = [16, 128], strides = [1, 1]} : vector<16x384xf32> to vector<16x128xf32>
    %12 = vector.extract_strided_slice %10 {offsets = [0, 0], sizes = [16, 128], strides = [1, 1]} : vector<16x256xf32> to vector<16x128xf32>
    %13 = arith.addf %11, %12 : vector<16x128xf32>
    %cst_12 = arith.constant 5.000000e-01 : f32
    %14 = vector.broadcast %cst_12 : f32 to vector<16x128xf32>
    %15 = arith.mulf %14, %13 : vector<16x128xf32>
    %16 = math.tanh %15 : vector<16x128xf32>
    %cst_13 = arith.constant 5.000000e-01 : f32
    %17 = vector.broadcast %cst_13 : f32 to vector<16x128xf32>
    %18 = arith.mulf %17, %16 : vector<16x128xf32>
    %cst_14 = arith.constant 5.000000e-01 : f32
    %19 = vector.broadcast %cst_14 : f32 to vector<16x128xf32>
    %20 = arith.addf %18, %19 : vector<16x128xf32>
    %21 = vector.extract_strided_slice %9 {offsets = [0, 128], sizes = [16, 128], strides = [1, 1]} : vector<16x384xf32> to vector<16x128xf32>
    %22 = vector.extract_strided_slice %10 {offsets = [0, 128], sizes = [16, 128], strides = [1, 1]} : vector<16x256xf32> to vector<16x128xf32>
    %23 = arith.addf %21, %22 : vector<16x128xf32>
    %cst_15 = arith.constant 5.000000e-01 : f32
    %24 = vector.broadcast %cst_15 : f32 to vector<16x128xf32>
    %25 = arith.mulf %24, %23 : vector<16x128xf32>
    %26 = math.tanh %25 : vector<16x128xf32>
    %cst_16 = arith.constant 5.000000e-01 : f32
    %27 = vector.broadcast %cst_16 : f32 to vector<16x128xf32>
    %28 = arith.mulf %27, %26 : vector<16x128xf32>
    %cst_17 = arith.constant 5.000000e-01 : f32
    %29 = vector.broadcast %cst_17 : f32 to vector<16x128xf32>
    %30 = arith.addf %28, %29 : vector<16x128xf32>
    %31 = arith.mulf %20, %6 : vector<16x128xf32>
    %32 = arith.truncf %31 : vector<16x128xf32> to vector<16x128xbf16>
    %33 = vector.extract_strided_slice %9 {offsets = [0, 256], sizes = [16, 128], strides = [1, 1]} : vector<16x384xf32> to vector<16x128xf32>
    %cst_18 = arith.constant dense<0.000000e+00> : vector<16x128xf32>
    %34 = tpu.matmul %32, %2, %cst_18 {dimension_numbers = #tpu.dot_dimension_numbers<[1], [0], [0], [1], [0, 0, 1, 1], [], []>} : vector<16x128xbf16>, vector<128x128xbf16>, vector<16x128xf32> -> vector<16x128xf32>
    %35 = arith.addf %33, %34 : vector<16x128xf32>
    %36 = math.tanh %35 : vector<16x128xf32>
    %37 = arith.subf %6, %36 : vector<16x128xf32>
    %38 = arith.mulf %30, %37 : vector<16x128xf32>
    %39 = arith.addf %36, %38 : vector<16x128xf32>
    %c0_19 = arith.constant 0 : index
    %c0_20 = arith.constant 0 : index
    %40 = vector.load %arg7[%c0_19, %c0_20] : memref<16x128xf32, #tpu.memory_space<vmem>>, vector<16x128xf32>
    tpu.vector_store %arg7[%c0_19, %c0_20], %39 {strides = array<i32>} : memref<16x128xf32, #tpu.memory_space<vmem>>, vector<16x128xf32>,
    return
  }
  func.func @transform_0(%arg0: i32) -> (i32, i32) {
    %c0_i32 = arith.constant 0 : i32
    %c0_i32_0 = arith.constant 0 : i32
    return %arg0, %c0_i32 : i32, i32
  }
  func.func @transform_1(%arg0: i32) -> (i32, i32) {
    %c0_i32 = arith.constant 0 : i32
    %c0_i32_0 = arith.constant 0 : i32
    return %arg0, %c0_i32 : i32, i32
  }
  func.func @transform_2(%arg0: i32) -> (i32, i32) {
    %c0_i32 = arith.constant 0 : i32
    %c0_i32_0 = arith.constant 0 : i32
    %c0_i32_1 = arith.constant 0 : i32
    return %c0_i32, %c0_i32_0 : i32, i32
  }
  func.func @transform_3(%arg0: i32) -> (i32, i32) {
    %c0_i32 = arith.constant 0 : i32
    %c0_i32_0 = arith.constant 0 : i32
    %c0_i32_1 = arith.constant 0 : i32
    return %c0_i32, %c0_i32_0 : i32, i32
  }
  func.func @transform_4(%arg0: i32) -> (i32, i32) {
    %c0_i32 = arith.constant 0 : i32
    %c0_i32_0 = arith.constant 0 : i32
    %c0_i32_1 = arith.constant 0 : i32
    return %c0_i32, %c0_i32_0 : i32, i32
  }
  func.func @transform_5(%arg0: i32) -> (i32, i32) {
    %c0_i32 = arith.constant 0 : i32
    %c0_i32_0 = arith.constant 0 : i32
    %c0_i32_1 = arith.constant 0 : i32
    return %c0_i32, %c0_i32_0 : i32, i32
  }
  func.func @transform_6(%arg0: i32) -> (i32, i32) {
    %c0_i32 = arith.constant 0 : i32
    %c0_i32_0 = arith.constant 0 : i32
    return %arg0, %c0_i32 : i32, i32
  }
}

</mosaic_0001>

<bundles_post_ra>
// kernel: tpu_custom_call.1
= control target key start
LH: loop header
LB: loop body
LE: loop exit
PB: predicated region body
PF: predicated region fallthrough
CT: control target
= control target key end

     0   :  { %11 = vsyncpa [#allocation3], 0  ;;  %s995_s0 = inlined_call_operand.hbm [shape: bf16[16,16], index: 0, kind: input, shape index: {}]   ;;  %s996_s1 = inlined_call_operand.hbm [shape: bf16[16,128], index: 1, kind: input, shape index: {}]   ;;  %s997_s2 = inlined_call_operand.hbm [shape: bf16[16,384], index: 2, kind: input, shape index: {}]   ;;  %s998_s3 = inlined_call_operand.hbm [shape: bf16[128,256], index: 3, kind: input, shape index: {}]   ;;  %s999_s4 = inlined_call_operand.hbm [shape: bf16[128,128], index: 4, kind: input, shape index: {}]   ;;  %s1000_s5 = inlined_call_operand.vmem [shape: f32[1,384], index: 5, kind: input, shape index: {}]   ;;  %s1001_s6 = inlined_call_operand.hbm [shape: f32[16,128], index: 6, kind: output, shape index: {}]  }
   0x1   :  { %12 = vsyncpa [#allocation6], 0 }
   0x2   :  { %13 = vsyncpa [#allocation9], 0 }
   0x3   :  { %14 = vsyncpa [#allocation4], 0  ;;  %s821_s21 = smov [#allocation5]   ;;  %s822_s23 = smov [#allocation8]  }
   0x4   :  { %s32_s22 = sshll.u32 %s821_s21, 4  ;;  %s56_s24 = sshll.u32 %s822_s23, 4  ;;  %s33_s22 = int_to_ptr.vmem [resolvable:$true] %s32_s22  ;;  %s871_s24 = int_to_ptr.vmem [resolvable:$true] %s56_s24 }
   0x5   :  { %s681_s27 = scalar_lea.hbm %s996_s1, 128 }
   0x6   :  { %p682_p0 = scmp.ne.s32.totalorder %s996_s1, %s681_s27  ;;  %p685_p1 = scmp.lt.u32.totalorder %s681_s27, %s996_s1 }
   0x8   :  { %p687_p2 = pnand %p685_p1, %p682_p0 }
   0xa   :  { %690 = shalt.err (!%p687_p2)
}
   0xb   :  { %s691_s8 = scalar_lea.vmem %s33_s22, 128  ;;  %p696_p4 = scmp.lt.s32.totalorder %s33_s22, %s33_s22 }
   0xc   :  { %p692_p3 = scmp.ne.s32.totalorder %s33_s22, %s691_s8  ;;  %p697_p5 = scmp.lt.s32.totalorder %s691_s8, %s691_s8 }
   0xe   :  { %p698_p6 = por %p697_p5, %p696_p4 }
  0x10   :  { %p699_p7 = pnand %p698_p6, %p692_p3 }
  0x12   :  { %702 = shalt.err (!%p699_p7)
}
  0x13   :  { %s823_s9 = smov 64   ;;  %s824_s10 = smov 4  }
  0x14   :  { %38 = dma.hbm_to_vmem [thread:$0]  %s996_s1, 128, %s33_s22, [#allocation6], %s823_s9, %s823_s9, %s824_s10  }
  0x15   :  { %s703_s15 = scalar_lea.hbm %s998_s3, 2048 }
  0x16   :  { %p704_p8 = scmp.ne.s32.totalorder %s998_s3, %s703_s15  ;;  %p707_p9 = scmp.lt.u32.totalorder %s703_s15, %s998_s3 }
  0x18   :  { %p709_p10 = pnand %p707_p9, %p704_p8 }
  0x1a   :  { %712 = shalt.err (!%p709_p10)
}
  0x1b   :  { %s713_s20 = scalar_lea.vmem %s871_s24, 2048  ;;  %p718_p12 = scmp.lt.s32.totalorder %s871_s24, %s871_s24 }
  0x1c   :  { %p714_p11 = scmp.ne.s32.totalorder %s871_s24, %s713_s20  ;;  %p719_p13 = scmp.lt.s32.totalorder %s713_s20, %s713_s20 }
  0x1e   :  { %p720_p0 = por %p719_p13, %p718_p12 }
  0x20   :  { %p721_p1 = pnand %p720_p0, %p714_p11 }
  0x22   :  { %724 = shalt.err (!%p721_p1)
}
  0x23   :  { %s825_s1 = smov 128   ;;  %s826_s21 = smov 8  }
  0x24   :  { %62 = dma.hbm_to_vmem [thread:$0]  %s998_s3, 2048, %s871_s24, [#allocation9], %s825_s1, %s825_s1, %s826_s21  }
  0x25   :  { %s827_s25 = smov [#allocation2]   ;;  %s828_s27 = smov [#allocation7]  }
  0x26   :  { %s20_s26 = sshll.u32 %s827_s25, 4  ;;  %s44_s28 = sshll.u32 %s828_s27, 4  ;;  %s21_s26 = int_to_ptr.vmem [resolvable:$true] %s20_s26  ;;  %s908_s28 = int_to_ptr.vmem [resolvable:$true] %s44_s28 }
  0x27   :  { %s725_s7 = scalar_lea.hbm %s995_s0, 128 }
  0x28   :  { %p726_p2 = scmp.ne.s32.totalorder %s995_s0, %s725_s7  ;;  %p729_p3 = scmp.lt.u32.totalorder %s725_s7, %s995_s0 }
  0x2a   :  { %p731_p4 = pnand %p729_p3, %p726_p2 }
  0x2c   :  { %734 = shalt.err (!%p731_p4)
}
  0x2d   :  { %s735_s3 = scalar_lea.vmem %s21_s26, 128  ;;  %p740_p6 = scmp.lt.s32.totalorder %s21_s26, %s21_s26 }
  0x2e   :  { %p736_p5 = scmp.ne.s32.totalorder %s21_s26, %s735_s3  ;;  %p741_p7 = scmp.lt.s32.totalorder %s735_s3, %s735_s3 }
  0x30   :  { %p742_p8 = por %p741_p7, %p740_p6 }
  0x32   :  { %p743_p9 = pnand %p742_p8, %p736_p5 }
  0x34   :  { %746 = shalt.err (!%p743_p9)
}
  0x35   :  { %26 = dma.hbm_to_vmem [thread:$0]  %s995_s0, 128, %s21_s26, [#allocation3], %s823_s9, %s823_s9, %s824_s10  }
  0x36   :  { %s747_s17 = scalar_lea.hbm %s997_s2, 384 }
  0x37   :  { %p748_p10 = scmp.ne.s32.totalorder %s997_s2, %s747_s17  ;;  %p751_p11 = scmp.lt.u32.totalorder %s747_s17, %s997_s2 }
  0x39   :  { %p753_p12 = pnand %p751_p11, %p748_p10 }
  0x3b   :  { %756 = shalt.err (!%p753_p12)
}
  0x3c   :  { %s757_s23 = scalar_lea.vmem %s908_s28, 384  ;;  %p762_p0 = scmp.lt.s32.totalorder %s908_s28, %s908_s28 }
  0x3d   :  { %p758_p13 = scmp.ne.s32.totalorder %s908_s28, %s757_s23  ;;  %p763_p1 = scmp.lt.s32.totalorder %s757_s23, %s757_s23 }
  0x3f   :  { %p764_p2 = por %p763_p1, %p762_p0 }
  0x41   :  { %p765_p3 = pnand %p764_p2, %p758_p13 }
  0x43   :  { %768 = shalt.err (!%p765_p3)
}
  0x44   :  { %s829_s0 = smov 192   ;;  %s830_s25 = smov 12  }
  0x45   :  { %50 = dma.hbm_to_vmem [thread:$0]  %s997_s2, 384, %s908_s28, [#allocation6], %s829_s0, %s829_s0, %s830_s25  }
  0x46   :  { %s831_s29 = smov [#allocation10]   ;;  %s769_s11 = scalar_lea.hbm %s999_s4, 1024 }
  0x47   :  { %s68_s30 = sshll.u32 %s831_s29, 4  ;;  %p770_p4 = scmp.ne.s32.totalorder %s999_s4, %s769_s11  ;;  %s69_s30 = int_to_ptr.vmem [resolvable:$true] %s68_s30 }
  0x48   :  { %p773_p5 = scmp.lt.u32.totalorder %s769_s11, %s999_s4 }
  0x4a   :  { %p775_p6 = pnand %p773_p5, %p770_p4 }
  0x4c   :  { %778 = shalt.err (!%p775_p6)
}
  0x4d   :  { %s779_s14 = scalar_lea.vmem %s69_s30, 1024  ;;  %p784_p8 = scmp.lt.s32.totalorder %s69_s30, %s69_s30 }
  0x4e   :  { %p780_p7 = scmp.ne.s32.totalorder %s69_s30, %s779_s14  ;;  %p785_p9 = scmp.lt.s32.totalorder %s779_s14, %s779_s14 }
  0x50   :  { %p786_p10 = por %p785_p9, %p784_p8 }
  0x52   :  { %p787_p11 = pnand %p786_p10, %p780_p7 }
  0x54   :  { %790 = shalt.err (!%p787_p11)
}
  0x55   :  { %74 = dma.hbm_to_vmem [thread:$0]  %s999_s4, 1024, %s69_s30, [#allocation9], %s823_s9, %s823_s9, %s824_s10  }
  0x56   :  { %813 = dma.done.wait [#allocation3], 128  }
  0x57   :  { %814 = vsyncadd [#allocation3], 4294967168 }
  0x58   :  { %815 = dma.done.wait [#allocation6], 512  }
  0x59   :  { %816 = vsyncadd [#allocation6], 4294966784 }
  0x5a   :  { %817 = dma.done.wait [#allocation9], 3072  }
  0x5b   :  { %818 = vsyncadd [#allocation9], 4294964224  ;;  %v832_v0 = vmov 0   ;;  %v833_v1 = vmov 0.0   ;;  %vm834_vm0 = vmmov 0   ;;  %v636_v6 = vld [vmem:[#allocation2] sm:$0xff]   ;;  %v137_v31 = vlaneseq }
  0x5c   :  { %209 = vmatprep.mubr.bf16.mxu0 %v832_v0  ;;  %575 = vmatprep.subr.bf16.mxu1 %v833_v1  ;;  %v630_v2 = vld [vmem:[#allocation7 + $0x4] ss:$12 sps:$4 sm:$0xff]   ;;  %v632_v3 = vld [vmem:[#allocation7] ss:$12 sps:$4 sm:$0xff]   ;;  %vm173_vm1 = vcmask 130048   ;;  %v660_v15 = vld [vmem:[#allocation10] sm:$0xff]  }
  0x5d   :  { %577 = vmatprep.mubr.msk.bf16.mxu1 %vm834_vm0, %v833_v1  ;;  %177 = vmatprep.subr.bf16.mxu0 %v630_v2  ;;  %v633_v4 = vld [vmem:[#allocation8] ss:$8 sps:$4 sm:$0xff]   ;;  %v635_v5 = vld [vmem:[#allocation8 + $0x4] ss:$8 sps:$4 sm:$0xff]   ;;  %v639_v7 = vld [vmem:[#allocation8 + $0x14] ss:$8 sps:$4 sm:$0xff]  }
  0x5e   :  { %178 = vmatpush1.bf16.msra.mxu0 %v632_v3  ;;  %v637_v8 = vld [vmem:[#allocation8 + $0x10] ss:$8 sps:$4 sm:$0xff]   ;;  %v642_v9 = vld [vmem:[#allocation8 + $0x24] ss:$8 sps:$4 sm:$0xff]   ;;  %v640_v10 = vld [vmem:[#allocation8 + $0x20] ss:$8 sps:$4 sm:$0xff]  }
  0x5f   :  { %347 = vmatprep.subr.bf16.mxu0 %v635_v5  ;;  %v645_v11 = vld [vmem:[#allocation8 + $0x34] ss:$8 sps:$4 sm:$0xff]   ;;  %v643_v13 = vld [vmem:[#allocation8 + $0x30] ss:$8 sps:$4 sm:$0xff]   ;;  %v648_v14 = vld [vmem:[#allocation8 + $0x44] ss:$8 sps:$4 sm:$0xff]  }
  0x60   :  { %v659_v12 = vld [vmem:[#allocation7 + $0x8] ss:$12 sps:$4 sm:$0xff]   ;;  %v646_v16 = vld [vmem:[#allocation8 + $0x40] ss:$8 sps:$4 sm:$0xff]   ;;  %v654_v20 = vld [vmem:[#allocation8 + $0x64] ss:$8 sps:$4 sm:$0xff]  }
  0x61   :  { %537 = vmatmul.mubr.msk.bf16.vlgmr.msra.gmra.mrb[0].mxu0 %vm173_vm1, %v636_v6  ;;  %576 = vmatpush3.bf16.msra.mxu1 %v659_v12  ;;  %v651_v17 = vld [vmem:[#allocation8 + $0x54] ss:$8 sps:$4 sm:$0xff]   ;;  %v661_v18 = vld [vmem:[#allocation10 + $0x8] sm:$0xff]   ;;  %v649_v19 = vld [vmem:[#allocation8 + $0x50] ss:$8 sps:$4 sm:$0xff]   ;;  %v138_v32 = vshrl.u32 %v137_v31, 7 }
  0x62   :  { %348 = vmatpush1.bf16.msra.mxu0 %v633_v4  ;;  %379 = vmatprep.mubr.bf16.mxu0 %v832_v0  ;;  %v652_v21 = vld [vmem:[#allocation8 + $0x60] ss:$8 sps:$4 sm:$0xff]   ;;  %v657_v22 = vld [vmem:[#allocation8 + $0x74] ss:$8 sps:$4 sm:$0xff]   ;;  %v655_v23 = vld [vmem:[#allocation8 + $0x70] ss:$8 sps:$4 sm:$0xff]  }
  0x63   :  { %349 = vmatprep.subr.bf16.mxu0 %v639_v7  ;;  %581 = vmatprep.subr.bf16.mxu1 %v833_v1  ;;  %v967_v24 = vld [vmem:[#allocation5] sm:$0xff]   ;;  %v662_v25 = vld [vmem:[#allocation10 + $0x10] sm:$0xff]   ;;  %v663_v26 = vld [vmem:[#allocation10 + $0x18] sm:$0xff]   ;;  %v139_v33 = vsub.s32 0, %v138_v32  ;;  %v143_v55 = vsub.s32 1, %v138_v32  ;;  %v147_v60 = vsub.s32 2, %v138_v32 }
  0x64   :  { %578 = vmatmul.mubr.msk.bf16.vlgmr.msra.gmra.mrb[0].mxu1 %vm173_vm1, %v636_v6  ;;  %v664_v27 = vld [vmem:[#allocation10 + $0x20] sm:$0xff]   ;;  %v665_v28 = vld [vmem:[#allocation10 + $0x28] sm:$0xff]   ;;  %v666_v29 = vld [vmem:[#allocation10 + $0x30] sm:$0xff]   ;;  %v134_v47 = vunpack.c.l.bf16 %v967_v24  ;;  %v135_v49 = vunpack.c.h.bf16 %v967_v24 }
  0x65   :  { %582 = vmatpush3.bf16.msra.mxu1 %v660_v15  ;;  %597 = vmatprep.mubr.msk.bf16.mxu1 %vm834_vm0, %v833_v1  ;;  %v667_v30 = vld [vmem:[#allocation10 + $0x38] sm:$0xff]  }
  0x66   :  { %350 = vmatpush1.bf16.msra.mxu0 %v637_v8  ;;  %583 = vmatprep.subr.bf16.mxu1 %v833_v1  ;;  %v129_v34 = vld [vmem:[%s1000_s5] sm:$0x7]  ;;  %s835_s5 = smov [#allocation11]  }
  0x67   :  { %351 = vmatprep.subr.bf16.mxu0 %v642_v9  ;;  %v140_v35 = vrot.slane %v129_v34, %v139_v33  ;;  %v144_v56 = vrot.slane %v129_v34, %v143_v55  ;;  %v148_v62 = vrot.slane %v129_v34, %v147_v60  ;;  %s519_s10 = sshll.u32 %s835_s5, 4  ;;  %s520_s10 = int_to_ptr.vmem [resolvable:$true] %s519_s10 }
  0x68   :  { %s791_s15 = scalar_lea.vmem %s520_s10, 256  ;;  %p796_p13 = scmp.lt.s32.totalorder %s520_s10, %s520_s10 }
  0x69   :  { %584 = vmatpush3.bf16.msra.mxu1 %v661_v18  ;;  %p792_p12 = scmp.ne.s32.totalorder %s520_s10, %s791_s15  ;;  %p797_p0 = scmp.lt.s32.totalorder %s791_s15, %s791_s15 }
  0x6a   :  { %352 = vmatpush1.bf16.msra.mxu0 %v640_v10  ;;  %585 = vmatprep.subr.bf16.mxu1 %v833_v1 }
  0x6b   :  { %353 = vmatprep.subr.bf16.mxu0 %v645_v11  ;;  %p798_p1 = por %p797_p0, %p796_p13 }
  0x6d   :  { %586 = vmatpush3.bf16.msra.mxu1 %v662_v25  ;;  %p799_p2 = pnand %p798_p1, %p792_p12 }
  0x6e   :  { %354 = vmatpush1.bf16.msra.mxu0 %v643_v13  ;;  %587 = vmatprep.subr.bf16.mxu1 %v833_v1 }
  0x6f   :  { %355 = vmatprep.subr.bf16.mxu0 %v648_v14 }
  0x71   :  { %588 = vmatpush3.bf16.msra.mxu1 %v663_v26 }
  0x72   :  { %356 = vmatpush1.bf16.msra.mxu0 %v646_v16  ;;  %589 = vmatprep.subr.bf16.mxu1 %v833_v1 }
  0x73   :  { %357 = vmatprep.subr.bf16.mxu0 %v651_v17 }
  0x75   :  { %590 = vmatpush3.bf16.msra.mxu1 %v664_v27 }
  0x76   :  { %358 = vmatpush1.bf16.msra.mxu0 %v649_v19  ;;  %591 = vmatprep.subr.bf16.mxu1 %v833_v1 }
  0x77   :  { %359 = vmatprep.subr.bf16.mxu0 %v654_v20 }
  0x79   :  { %592 = vmatpush3.bf16.msra.mxu1 %v665_v28 }
  0x7a   :  { %360 = vmatpush1.bf16.msra.mxu0 %v652_v21  ;;  %593 = vmatprep.subr.bf16.mxu1 %v833_v1 }
  0x7b   :  { %361 = vmatprep.subr.bf16.mxu0 %v657_v22 }
  0x7d   :  { %594 = vmatpush3.bf16.msra.mxu1 %v666_v29 }
  0x7e   :  { %362 = vmatpush1.bf16.msra.mxu0 %v655_v23  ;;  %595 = vmatprep.subr.bf16.mxu1 %v833_v1 }
  0x81   :  { %380 = vmatmul.mubr.bf16.vlgmr.msra.gmra.mrb[0].mxu0 %v967_v24  ;;  %596 = vmatpush3.bf16.msra.mxu1 %v667_v30 }
 0x154   :  { %v381_v36 = vpop.f32.mrb[0].mxu0 }
 0x155   :  { %v601_v37 = vadd.f32 %v381_v36, %v140_v35  ;;  %v383_v38 = vpop.f32.mrb[1].mxu0 }
 0x156   :  { %v385_v39 = vpop.f32.mrb[2].mxu0  ;;  %v602_v57 = vadd.f32 %v383_v38, %v144_v56 }
 0x157   :  { %v392_v40 = vmul.f32 0.5, %v601_v37  ;;  %v603_v41 = vadd.f32 %v385_v39, %v140_v35  ;;  %v387_v42 = vpop.f32.mrb[3].mxu0 }
 0x158   :  { %v604_v58 = vadd.f32 %v387_v42, %v144_v56  ;;  %v402_v59 = vmul.f32 0.5, %v602_v57 }
 0x159   :  { %669 = vtanh.f32 %v392_v40  ;;  %v393_v43 = vmul.f32 0.5, %v603_v41 }
 0x15a   :  { %v403_v61 = vmul.f32 0.5, %v604_v58 }
 0x15b   :  { %671 = vtanh.f32 %v393_v43 }
 0x15c   :  { %673 = vtanh.f32 %v402_v59 }
 0x15d   :  { %675 = vtanh.f32 %v403_v61 }
 0x163   :  { %v670_v44 = vpop.eup %669 }
 0x164   :  { %v396_v45 = vmul.f32 0.5, %v670_v44 }
 0x165   :  { %v672_v46 = vpop.eup %671 }
 0x166   :  { %v398_v48 = vadd.f32 0.5, %v396_v45  ;;  %v397_v50 = vmul.f32 0.5, %v672_v46  ;;  %v674_v5 = vpop.eup %673 }
 0x167   :  { %v676_v6 = vpop.eup %675  ;;  %v406_v7 = vmul.f32 0.5, %v674_v5 }
 0x168   :  { %v399_v51 = vadd.f32 0.5, %v397_v50  ;;  %v410_v52 = vmul.f32 %v398_v48, %v134_v47  ;;  %v407_v8 = vmul.f32 0.5, %v676_v6 }
 0x169   :  { %v408_v10 = vadd.f32 0.5, %v406_v7 }
 0x16a   :  { %v411_v53 = vmul.f32 %v399_v51, %v135_v49  ;;  %v409_v13 = vadd.f32 0.5, %v407_v8 }
 0x16c   :  { %v412_v54 = vpack.c.bf16 %v411_v53, %v410_v52 }
 0x16e   :  { %598 = vmatmul.mubr.bf16.vlgmr.msra.gmra.mrb[0].mxu1 %v412_v54 }
 0x241   :  { %v495_v63 = vpop.f32.mrb[0].mxu1 }
 0x242   :  { %v605_v0 = vadd.f32 %v495_v63, %v148_v62  ;;  %v599_v1 = vpop.f32.mrb[1].mxu1 }
 0x243   :  { %v498_v2 = vpop.f32.mrb[2].mxu1 }
 0x244   :  { %677 = vtanh.f32 %v605_v0  ;;  %v606_v3 = vadd.f32 %v498_v2, %v148_v62  ;;  %v600_v4 = vpop.f32.mrb[3].mxu1 }
 0x246   :  { %679 = vtanh.f32 %v606_v3 }
 0x24e   :  { %v678_v9 = vpop.eup %677 }
 0x24f   :  { %v506_v11 = vsub.f32 %v134_v47, %v678_v9 }
 0x250   :  { %v680_v12 = vpop.eup %679 }
 0x251   :  { %v507_v14 = vsub.f32 %v135_v49, %v680_v12  ;;  %v508_v15 = vmul.f32 %v506_v11, %v408_v10 }
 0x253   :  { %v509_v16 = vmul.f32 %v507_v14, %v409_v13  ;;  %v510_v17 = vadd.f32 %v678_v9, %v508_v15 }
 0x255   :  { %v511_v18 = vadd.f32 %v680_v12, %v509_v16  ;;  %512 = vst [vmem:[#allocation11] sm:$0xff] %v510_v17 }
 0x257   :  { %513 = vst [vmem:[#allocation11 + $0x8] sm:$0xff] %v511_v18 }
 0x258   :  { %802 = shalt.err (!%p799_p2)
}
 0x259   :  { %s803_s18 = scalar_lea.hbm %s1001_s6, 256 }
 0x25a   :  { %p804_p3 = scmp.ne.s32.totalorder %s1001_s6, %s803_s18  ;;  %p807_p4 = scmp.lt.u32.totalorder %s803_s18, %s1001_s6 }
 0x25c   :  { %p809_p5 = pnand %p807_p4, %p804_p3 }
 0x25e   :  { %812 = shalt.err (!%p809_p5)
}
 0x25f   :  { %525 = dma.vmem_to_hbm [thread:$0]  %s520_s10, 256, %s1001_s6, [#allocation4], %s825_s1, %s825_s1, %s826_s21  }
 0x260   :  { %819 = dma.done.wait [#allocation4], 256  }
 0x261   :  { %820 = vsyncadd [#allocation4], 4294967040 }
 0x262   :  { %529 = vsyncpa [#allocation3], 1 }
 0x263   :  { %530 = vsyncpa [#allocation6], 1 }
 0x264   :  { %531 = vsyncpa [#allocation9], 1 }
 0x265   :  { %532 = vsyncpa [#allocation4], 1 }

// kernel: tpu_custom_call.1
= control target key start
LH: loop header
LB: loop body
LE: loop exit
PB: predicated region body
PF: predicated region fallthrough
CT: control target
= control target key end

     0   :  { %11 = vsyncpa [#allocation3], 0  ;;  %s995_s0 = inlined_call_operand.hbm [shape: bf16[16,16], index: 0, kind: input, shape index: {}]   ;;  %s996_s1 = inlined_call_operand.hbm [shape: bf16[16,128], index: 1, kind: input, shape index: {}]   ;;  %s997_s2 = inlined_call_operand.hbm [shape: bf16[16,384], index: 2, kind: input, shape index: {}]   ;;  %s998_s3 = inlined_call_operand.hbm [shape: bf16[128,256], index: 3, kind: input, shape index: {}]   ;;  %s999_s4 = inlined_call_operand.hbm [shape: bf16[128,128], index: 4, kind: input, shape index: {}]   ;;  %s1000_s5 = inlined_call_operand.vmem [shape: f32[1,384], index: 5, kind: input, shape index: {}]   ;;  %s1001_s6 = inlined_call_operand.hbm [shape: f32[16,128], index: 6, kind: output, shape index: {}]  }
   0x1   :  { %12 = vsyncpa [#allocation6], 0 }
   0x2   :  { %13 = vsyncpa [#allocation9], 0 }
   0x3   :  { %14 = vsyncpa [#allocation4], 0  ;;  %s821_s21 = smov [#allocation5]   ;;  %s822_s23 = smov [#allocation8]  }
   0x4   :  { %s32_s22 = sshll.u32 %s821_s21, 4  ;;  %s56_s24 = sshll.u32 %s822_s23, 4  ;;  %s33_s22 = int_to_ptr.vmem [resolvable:$true] %s32_s22  ;;  %s871_s24 = int_to_ptr.vmem [resolvable:$true] %s56_s24 }
   0x5   :  { %s681_s27 = scalar_lea.hbm %s996_s1, 128 }
   0x6   :  { %p682_p0 = scmp.ne.s32.totalorder %s996_s1, %s681_s27  ;;  %p685_p1 = scmp.lt.u32.totalorder %s681_s27, %s996_s1 }
   0x8   :  { %p687_p2 = pnand %p685_p1, %p682_p0 }
   0xa   :  { %690 = shalt.err (!%p687_p2)
}
   0xb   :  { %s691_s8 = scalar_lea.vmem %s33_s22, 128  ;;  %p696_p4 = scmp.lt.s32.totalorder %s33_s22, %s33_s22 }
   0xc   :  { %p692_p3 = scmp.ne.s32.totalorder %s33_s22, %s691_s8  ;;  %p697_p5 = scmp.lt.s32.totalorder %s691_s8, %s691_s8 }
   0xe   :  { %p698_p6 = por %p697_p5, %p696_p4 }
  0x10   :  { %p699_p7 = pnand %p698_p6, %p692_p3 }
  0x12   :  { %702 = shalt.err (!%p699_p7)
}
  0x13   :  { %s823_s9 = smov 64   ;;  %s824_s10 = smov 4  }
  0x14   :  { %38 = dma.hbm_to_vmem [thread:$0]  %s996_s1, 128, %s33_s22, [#allocation6], %s823_s9, %s823_s9, %s824_s10  }
  0x15   :  { %s703_s15 = scalar_lea.hbm %s998_s3, 2048 }
  0x16   :  { %p704_p8 = scmp.ne.s32.totalorder %s998_s3, %s703_s15  ;;  %p707_p9 = scmp.lt.u32.totalorder %s703_s15, %s998_s3 }
  0x18   :  { %p709_p10 = pnand %p707_p9, %p704_p8 }
  0x1a   :  { %712 = shalt.err (!%p709_p10)
}
  0x1b   :  { %s713_s20 = scalar_lea.vmem %s871_s24, 2048  ;;  %p718_p12 = scmp.lt.s32.totalorder %s871_s24, %s871_s24 }
  0x1c   :  { %p714_p11 = scmp.ne.s32.totalorder %s871_s24, %s713_s20  ;;  %p719_p13 = scmp.lt.s32.totalorder %s713_s20, %s713_s20 }
  0x1e   :  { %p720_p0 = por %p719_p13, %p718_p12 }
  0x20   :  { %p721_p1 = pnand %p720_p0, %p714_p11 }
  0x22   :  { %724 = shalt.err (!%p721_p1)
}
  0x23   :  { %s825_s1 = smov 128   ;;  %s826_s21 = smov 8  }
  0x24   :  { %62 = dma.hbm_to_vmem [thread:$0]  %s998_s3, 2048, %s871_s24, [#allocation9], %s825_s1, %s825_s1, %s826_s21  }
  0x25   :  { %s827_s25 = smov [#allocation2]   ;;  %s828_s27 = smov [#allocation7]  }
  0x26   :  { %s20_s26 = sshll.u32 %s827_s25, 4  ;;  %s44_s28 = sshll.u32 %s828_s27, 4  ;;  %s21_s26 = int_to_ptr.vmem [resolvable:$true] %s20_s26  ;;  %s908_s28 = int_to_ptr.vmem [resolvable:$true] %s44_s28 }
  0x27   :  { %s725_s7 = scalar_lea.hbm %s995_s0, 128 }
  0x28   :  { %p726_p2 = scmp.ne.s32.totalorder %s995_s0, %s725_s7  ;;  %p729_p3 = scmp.lt.u32.totalorder %s725_s7, %s995_s0 }
  0x2a   :  { %p731_p4 = pnand %p729_p3, %p726_p2 }
  0x2c   :  { %734 = shalt.err (!%p731_p4)
}
  0x2d   :  { %s735_s3 = scalar_lea.vmem %s21_s26, 128  ;;  %p740_p6 = scmp.lt.s32.totalorder %s21_s26, %s21_s26 }
  0x2e   :  { %p736_p5 = scmp.ne.s32.totalorder %s21_s26, %s735_s3  ;;  %p741_p7 = scmp.lt.s32.totalorder %s735_s3, %s735_s3 }
  0x30   :  { %p742_p8 = por %p741_p7, %p740_p6 }
  0x32   :  { %p743_p9 = pnand %p742_p8, %p736_p5 }
  0x34   :  { %746 = shalt.err (!%p743_p9)
}
  0x35   :  { %26 = dma.hbm_to_vmem [thread:$0]  %s995_s0, 128, %s21_s26, [#allocation3], %s823_s9, %s823_s9, %s824_s10  }
  0x36   :  { %s747_s17 = scalar_lea.hbm %s997_s2, 384 }
  0x37   :  { %p748_p10 = scmp.ne.s32.totalorder %s997_s2, %s747_s17  ;;  %p751_p11 = scmp.lt.u32.totalorder %s747_s17, %s997_s2 }
  0x39   :  { %p753_p12 = pnand %p751_p11, %p748_p10 }
  0x3b   :  { %756 = shalt.err (!%p753_p12)
}
  0x3c   :  { %s757_s23 = scalar_lea.vmem %s908_s28, 384  ;;  %p762_p0 = scmp.lt.s32.totalorder %s908_s28, %s908_s28 }
  0x3d   :  { %p758_p13 = scmp.ne.s32.totalorder %s908_s28, %s757_s23  ;;  %p763_p1 = scmp.lt.s32.totalorder %s757_s23, %s757_s23 }
  0x3f   :  { %p764_p2 = por %p763_p1, %p762_p0 }
  0x41   :  { %p765_p3 = pnand %p764_p2, %p758_p13 }
  0x43   :  { %768 = shalt.err (!%p765_p3)
}
  0x44   :  { %s829_s0 = smov 192   ;;  %s830_s25 = smov 12  }
  0x45   :  { %50 = dma.hbm_to_vmem [thread:$0]  %s997_s2, 384, %s908_s28, [#allocation6], %s829_s0, %s829_s0, %s830_s25  }
  0x46   :  { %s831_s29 = smov [#allocation10]   ;;  %s769_s11 = scalar_lea.hbm %s999_s4, 1024 }
  0x47   :  { %s68_s30 = sshll.u32 %s831_s29, 4  ;;  %p770_p4 = scmp.ne.s32.totalorder %s999_s4, %s769_s11  ;;  %s69_s30 = int_to_ptr.vmem [resolvable:$true] %s68_s30 }
  0x48   :  { %p773_p5 = scmp.lt.u32.totalorder %s769_s11, %s999_s4 }
  0x4a   :  { %p775_p6 = pnand %p773_p5, %p770_p4 }
  0x4c   :  { %778 = shalt.err (!%p775_p6)
}
  0x4d   :  { %s779_s14 = scalar_lea.vmem %s69_s30, 1024  ;;  %p784_p8 = scmp.lt.s32.totalorder %s69_s30, %s69_s30 }
  0x4e   :  { %p780_p7 = scmp.ne.s32.totalorder %s69_s30, %s779_s14  ;;  %p785_p9 = scmp.lt.s32.totalorder %s779_s14, %s779_s14 }
  0x50   :  { %p786_p10 = por %p785_p9, %p784_p8 }
  0x52   :  { %p787_p11 = pnand %p786_p10, %p780_p7 }
  0x54   :  { %790 = shalt.err (!%p787_p11)
}
  0x55   :  { %74 = dma.hbm_to_vmem [thread:$0]  %s999_s4, 1024, %s69_s30, [#allocation9], %s823_s9, %s823_s9, %s824_s10  }
  0x56   :  { %813 = dma.done.wait [#allocation3], 128  }
  0x57   :  { %814 = vsyncadd [#allocation3], 4294967168 }
  0x58   :  { %815 = dma.done.wait [#allocation6], 512  }
  0x59   :  { %816 = vsyncadd [#allocation6], 4294966784 }
  0x5a   :  { %817 = dma.done.wait [#allocation9], 3072  }
  0x5b   :  { %818 = vsyncadd [#allocation9], 4294964224  ;;  %v832_v0 = vmov 0   ;;  %v833_v1 = vmov 0.0   ;;  %vm834_vm0 = vmmov 0   ;;  %v636_v6 = vld [vmem:[#allocation2] sm:$0xff]   ;;  %v137_v31 = vlaneseq }
  0x5c   :  { %209 = vmatprep.mubr.bf16.mxu0 %v832_v0  ;;  %575 = vmatprep.subr.bf16.mxu1 %v833_v1  ;;  %v630_v2 = vld [vmem:[#allocation7 + $0x4] ss:$12 sps:$4 sm:$0xff]   ;;  %v632_v3 = vld [vmem:[#allocation7] ss:$12 sps:$4 sm:$0xff]   ;;  %vm173_vm1 = vcmask 130048   ;;  %v660_v15 = vld [vmem:[#allocation10] sm:$0xff]  }
  0x5d   :  { %577 = vmatprep.mubr.msk.bf16.mxu1 %vm834_vm0, %v833_v1  ;;  %177 = vmatprep.subr.bf16.mxu0 %v630_v2  ;;  %v633_v4 = vld [vmem:[#allocation8] ss:$8 sps:$4 sm:$0xff]   ;;  %v635_v5 = vld [vmem:[#allocation8 + $0x4] ss:$8 sps:$4 sm:$0xff]   ;;  %v639_v7 = vld [vmem:[#allocation8 + $0x14] ss:$8 sps:$4 sm:$0xff]  }
  0x5e   :  { %178 = vmatpush1.bf16.msra.mxu0 %v632_v3  ;;  %v637_v8 = vld [vmem:[#allocation8 + $0x10] ss:$8 sps:$4 sm:$0xff]   ;;  %v642_v9 = vld [vmem:[#allocation8 + $0x24] ss:$8 sps:$4 sm:$0xff]   ;;  %v640_v10 = vld [vmem:[#allocation8 + $0x20] ss:$8 sps:$4 sm:$0xff]  }
  0x5f   :  { %347 = vmatprep.subr.bf16.mxu0 %v635_v5  ;;  %v645_v11 = vld [vmem:[#allocation8 + $0x34] ss:$8 sps:$4 sm:$0xff]   ;;  %v643_v13 = vld [vmem:[#allocation8 + $0x30] ss:$8 sps:$4 sm:$0xff]   ;;  %v648_v14 = vld [vmem:[#allocation8 + $0x44] ss:$8 sps:$4 sm:$0xff]  }
  0x60   :  { %v659_v12 = vld [vmem:[#allocation7 + $0x8] ss:$12 sps:$4 sm:$0xff]   ;;  %v646_v16 = vld [vmem:[#allocation8 + $0x40] ss:$8 sps:$4 sm:$0xff]   ;;  %v654_v20 = vld [vmem:[#allocation8 + $0x64] ss:$8 sps:$4 sm:$0xff]  }
  0x61   :  { %537 = vmatmul.mubr.msk.bf16.vlgmr.msra.gmra.mrb[0].mxu0 %vm173_vm1, %v636_v6  ;;  %576 = vmatpush3.bf16.msra.mxu1 %v659_v12  ;;  %v651_v17 = vld [vmem:[#allocation8 + $0x54] ss:$8 sps:$4 sm:$0xff]   ;;  %v661_v18 = vld [vmem:[#allocation10 + $0x8] sm:$0xff]   ;;  %v649_v19 = vld [vmem:[#allocation8 + $0x50] ss:$8 sps:$4 sm:$0xff]   ;;  %v138_v32 = vshrl.u32 %v137_v31, 7 }
  0x62   :  { %348 = vmatpush1.bf16.msra.mxu0 %v633_v4  ;;  %379 = vmatprep.mubr.bf16.mxu0 %v832_v0  ;;  %v652_v21 = vld [vmem:[#allocation8 + $0x60] ss:$8 sps:$4 sm:$0xff]   ;;  %v657_v22 = vld [vmem:[#allocation8 + $0x74] ss:$8 sps:$4 sm:$0xff]   ;;  %v655_v23 = vld [vmem:[#allocation8 + $0x70] ss:$8 sps:$4 sm:$0xff]  }
  0x63   :  { %349 = vmatprep.subr.bf16.mxu0 %v639_v7  ;;  %581 = vmatprep.subr.bf16.mxu1 %v833_v1  ;;  %v967_v24 = vld [vmem:[#allocation5] sm:$0xff]   ;;  %v662_v25 = vld [vmem:[#allocation10 + $0x10] sm:$0xff]   ;;  %v663_v26 = vld [vmem:[#allocation10 + $0x18] sm:$0xff]   ;;  %v139_v33 = vsub.s32 0, %v138_v32  ;;  %v143_v55 = vsub.s32 1, %v138_v32  ;;  %v147_v60 = vsub.s32 2, %v138_v32 }
  0x64   :  { %578 = vmatmul.mubr.msk.bf16.vlgmr.msra.gmra.mrb[0].mxu1 %vm173_vm1, %v636_v6  ;;  %v664_v27 = vld [vmem:[#allocation10 + $0x20] sm:$0xff]   ;;  %v665_v28 = vld [vmem:[#allocation10 + $0x28] sm:$0xff]   ;;  %v666_v29 = vld [vmem:[#allocation10 + $0x30] sm:$0xff]   ;;  %v134_v47 = vunpack.c.l.bf16 %v967_v24  ;;  %v135_v49 = vunpack.c.h.bf16 %v967_v24 }
  0x65   :  { %582 = vmatpush3.bf16.msra.mxu1 %v660_v15  ;;  %597 = vmatprep.mubr.msk.bf16.mxu1 %vm834_vm0, %v833_v1  ;;  %v667_v30 = vld [vmem:[#allocation10 + $0x38] sm:$0xff]  }
  0x66   :  { %350 = vmatpush1.bf16.msra.mxu0 %v637_v8  ;;  %583 = vmatprep.subr.bf16.mxu1 %v833_v1  ;;  %v129_v34 = vld [vmem:[%s1000_s5] sm:$0x7]  ;;  %s835_s5 = smov [#allocation11]  }
  0x67   :  { %351 = vmatprep.subr.bf16.mxu0 %v642_v9  ;;  %v140_v35 = vrot.slane %v129_v34, %v139_v33  ;;  %v144_v56 = vrot.slane %v129_v34, %v143_v55  ;;  %v148_v62 = vrot.slane %v129_v34, %v147_v60  ;;  %s519_s10 = sshll.u32 %s835_s5, 4  ;;  %s520_s10 = int_to_ptr.vmem [resolvable:$true] %s519_s10 }
  0x68   :  { %s791_s15 = scalar_lea.vmem %s520_s10, 256  ;;  %p796_p13 = scmp.lt.s32.totalorder %s520_s10, %s520_s10 }
  0x69   :  { %584 = vmatpush3.bf16.msra.mxu1 %v661_v18  ;;  %p792_p12 = scmp.ne.s32.totalorder %s520_s10, %s791_s15  ;;  %p797_p0 = scmp.lt.s32.totalorder %s791_s15, %s791_s15 }
  0x6a   :  { %352 = vmatpush1.bf16.msra.mxu0 %v640_v10  ;;  %585 = vmatprep.subr.bf16.mxu1 %v833_v1 }
  0x6b   :  { %353 = vmatprep.subr.bf16.mxu0 %v645_v11  ;;  %p798_p1 = por %p797_p0, %p796_p13 }
  0x6d   :  { %586 = vmatpush3.bf16.msra.mxu1 %v662_v25  ;;  %p799_p2 = pnand %p798_p1, %p792_p12 }
  0x6e   :  { %354 = vmatpush1.bf16.msra.mxu0 %v643_v13  ;;  %587 = vmatprep.subr.bf16.mxu1 %v833_v1 }
  0x6f   :  { %355 = vmatprep.subr.bf16.mxu0 %v648_v14 }
  0x71   :  { %588 = vmatpush3.bf16.msra.mxu1 %v663_v26 }
  0x72   :  { %356 = vmatpush1.bf16.msra.mxu0 %v646_v16  ;;  %589 = vmatprep.subr.bf16.mxu1 %v833_v1 }
  0x73   :  { %357 = vmatprep.subr.bf16.mxu0 %v651_v17 }
  0x75   :  { %590 = vmatpush3.bf16.msra.mxu1 %v664_v27 }
  0x76   :  { %358 = vmatpush1.bf16.msra.mxu0 %v649_v19  ;;  %591 = vmatprep.subr.bf16.mxu1 %v833_v1 }
  0x77   :  { %359 = vmatprep.subr.bf16.mxu0 %v654_v20 }
  0x79   :  { %592 = vmatpush3.bf16.msra.mxu1 %v665_v28 }
  0x7a   :  { %360 = vmatpush1.bf16.msra.mxu0 %v652_v21  ;;  %593 = vmatprep.subr.bf16.mxu1 %v833_v1 }
  0x7b   :  { %361 = vmatprep.subr.bf16.mxu0 %v657_v22 }
  0x7d   :  { %594 = vmatpush3.bf16.msra.mxu1 %v666_v29 }
  0x7e   :  { %362 = vmatpush1.bf16.msra.mxu0 %v655_v23  ;;  %595 = vmatprep.subr.bf16.mxu1 %v833_v1 }
  0x81   :  { %380 = vmatmul.mubr.bf16.vlgmr.msra.gmra.mrb[0].mxu0 %v967_v24  ;;  %596 = vmatpush3.bf16.msra.mxu1 %v667_v30 }
 0x154   :  { %v381_v36 = vpop.f32.mrb[0].mxu0 }
 0x155   :  { %v601_v37 = vadd.f32 %v381_v36, %v140_v35  ;;  %v383_v38 = vpop.f32.mrb[1].mxu0 }
 0x156   :  { %v385_v39 = vpop.f32.mrb[2].mxu0  ;;  %v602_v57 = vadd.f32 %v383_v38, %v144_v56 }
 0x157   :  { %v392_v40 = vmul.f32 0.5, %v601_v37  ;;  %v603_v41 = vadd.f32 %v385_v39, %v140_v35  ;;  %v387_v42 = vpop.f32.mrb[3].mxu0 }
 0x158   :  { %v604_v58 = vadd.f32 %v387_v42, %v144_v56  ;;  %v402_v59 = vmul.f32 0.5, %v602_v57 }
 0x159   :  { %669 = vtanh.f32 %v392_v40  ;;  %v393_v43 = vmul.f32 0.5, %v603_v41 }
 0x15a   :  { %v403_v61 = vmul.f32 0.5, %v604_v58 }
 0x15b   :  { %671 = vtanh.f32 %v393_v43 }
 0x15c   :  { %673 = vtanh.f32 %v402_v59 }
 0x15d   :  { %675 = vtanh.f32 %v403_v61 }
 0x163   :  { %v670_v44 = vpop.eup %669 }
 0x164   :  { %v396_v45 = vmul.f32 0.5, %v670_v44 }
 0x165   :  { %v672_v46 = vpop.eup %671 }
 0x166   :  { %v398_v48 = vadd.f32 0.5, %v396_v45  ;;  %v397_v50 = vmul.f32 0.5, %v672_v46  ;;  %v674_v5 = vpop.eup %673 }
 0x167   :  { %v676_v6 = vpop.eup %675  ;;  %v406_v7 = vmul.f32 0.5, %v674_v5 }
 0x168   :  { %v399_v51 = vadd.f32 0.5, %v397_v50  ;;  %v410_v52 = vmul.f32 %v398_v48, %v134_v47  ;;  %v407_v8 = vmul.f32 0.5, %v676_v6 }
 0x169   :  { %v408_v10 = vadd.f32 0.5, %v406_v7 }
 0x16a   :  { %v411_v53 = vmul.f32 %v399_v51, %v135_v49  ;;  %v409_v13 = vadd.f32 0.5, %v407_v8 }
 0x16c   :  { %v412_v54 = vpack.c.bf16 %v411_v53, %v410_v52 }
 0x16e   :  { %598 = vmatmul.mubr.bf16.vlgmr.msra.gmra.mrb[0].mxu1 %v412_v54 }
 0x241   :  { %v495_v63 = vpop.f32.mrb[0].mxu1 }
 0x242   :  { %v605_v0 = vadd.f32 %v495_v63, %v148_v62  ;;  %v599_v1 = vpop.f32.mrb[1].mxu1 }
 0x243   :  { %v498_v2 = vpop.f32.mrb[2].mxu1 }
 0x244   :  { %677 = vtanh.f32 %v605_v0  ;;  %v606_v3 = vadd.f32 %v498_v2, %v148_v62  ;;  %v600_v4 = vpop.f32.mrb[3].mxu1 }
 0x246   :  { %679 = vtanh.f32 %v606_v3 }
 0x24e   :  { %v678_v9 = vpop.eup %677 }
 0x24f   :  { %v506_v11 = vsub.f32 %v134_v47, %v678_v9 }
 0x250   :  { %v680_v12 = vpop.eup %679 }
 0x251   :  { %v507_v14 = vsub.f32 %v135_v49, %v680_v12  ;;  %v508_v15 = vmul.f32 %v506_v11, %v408_v10 }
 0x253   :  { %v509_v16 = vmul.f32 %v507_v14, %v409_v13  ;;  %v510_v17 = vadd.f32 %v678_v9, %v508_v15 }
 0x255   :  { %v511_v18 = vadd.f32 %v680_v12, %v509_v16  ;;  %512 = vst [vmem:[#allocation11] sm:$0xff] %v510_v17 }
 0x257   :  { %513 = vst [vmem:[#allocation11 + $0x8] sm:$0xff] %v511_v18 }
 0x258   :  { %802 = shalt.err (!%p799_p2)
}
 0x259   :  { %s803_s18 = scalar_lea.hbm %s1001_s6, 256 }
 0x25a   :  { %p804_p3 = scmp.ne.s32.totalorder %s1001_s6, %s803_s18  ;;  %p807_p4 = scmp.lt.u32.totalorder %s803_s18, %s1001_s6 }
 0x25c   :  { %p809_p5 = pnand %p807_p4, %p804_p3 }
 0x25e   :  { %812 = shalt.err (!%p809_p5)
}
 0x25f   :  { %525 = dma.vmem_to_hbm [thread:$0]  %s520_s10, 256, %s1001_s6, [#allocation4], %s825_s1, %s825_s1, %s826_s21  }
 0x260   :  { %819 = dma.done.wait [#allocation4], 256  }
 0x261   :  { %820 = vsyncadd [#allocation4], 4294967040 }
 0x262   :  { %529 = vsyncpa [#allocation3], 1 }
 0x263   :  { %530 = vsyncpa [#allocation6], 1 }
 0x264   :  { %531 = vsyncpa [#allocation9], 1 }
 0x265   :  { %532 = vsyncpa [#allocation4], 1 }

</bundles_post_ra>
